<compile_context>
chip_gen: v6e
topology: v6e:2x2x1
jax: 0.10.0
libtpu: 0.0.40
codegen_flags: <defaults>
</compile_context>

<pallas_src>
import functools

import jax
import jax.numpy as jnp
from jax.experimental import pallas as pl
from jax.experimental.pallas import tpu as pltpu

_SUBLANE = 8


def _round_up(x, m):
    return -(-x // m) * m


def _choose_tile_b(B, requested):
    """Pick the batch tile.

    Big tiles amortize per-step overhead; but when the whole batch would fit in
    one tile we split it in two (multiple-of-8 sublanes) so the 1-D grid has
    >=2 steps -> v7x dual-TC sharding + DMA/compute overlap still apply.
    """
    if B > requested:
        return max(_SUBLANE, _round_up(requested, _SUBLANE))
    if B >= 4 * _SUBLANE:
        return _round_up(pl.cdiv(B, 2), _SUBLANE)
    return B  # tiny batch: single step, block == full batch (legal)


def _generator_kernel(xn_ref, xc_ref, w1n_ref, w1c_ref, b1_ref, w2_ref, b2_ref,
                      o_ref):
    # Fused concat:  cat(xn, xc) @ W1  ==  xn @ W1[:n_noise] + xc @ W1[n_noise:]
    h = jnp.dot(xn_ref[...], w1n_ref[...], preferred_element_type=jnp.float32)
    h = h + jnp.dot(xc_ref[...], w1c_ref[...],
                    preferred_element_type=jnp.float32)
    h = jnp.tanh(h + b1_ref[...])                 # bias + tanh in f32 (VPU/EUP)
    y = jnp.dot(h.astype(w2_ref.dtype), w2_ref[...],
                preferred_element_type=jnp.float32)
    o_ref[...] = (y + b2_ref[...]).astype(o_ref.dtype)


def generator_forward(x_noise, x_cond, params, *, tile_b=2048,
                      matmul_dtype=None, out_dtype=None):
    """Pallas equivalent of Generator.forward (batch_norm=False).

    params = (w1, b1, w2, b2) with w1:[n_inputs, hidden], b1:[1, hidden],
    w2:[hidden, n_outputs], b2:[1, n_outputs] (weights transposed vs PyTorch
    so the kernel computes x @ W directly).

    matmul_dtype: e.g. jnp.bfloat16 to run the MXU in bf16 with f32
    accumulation.  For best results hand in x_noise/x_cond already in that
    dtype (the cast here is a fallback and costs an extra XLA pass).
    out_dtype: output dtype (defaults to x_noise.dtype); bf16 halves writeback.
    """
    w1, b1, w2, b2 = params
    B, n_noise = x_noise.shape
    n_cond = x_cond.shape[1]
    hidden = w1.shape[1]
    n_out = w2.shape[1]
    if out_dtype is None:
        out_dtype = x_noise.dtype

    # Split W1 row-wise so the channel concat fuses into two summed matmuls.
    w1n = w1[:n_noise]
    w1c = w1[n_noise:]
    b1f = b1.astype(jnp.float32)
    b2f = b2.astype(jnp.float32)

    if matmul_dtype is not None:
        # Weight casts are one-off and the weights stay VMEM-resident.
        w1n = w1n.astype(matmul_dtype)
        w1c = w1c.astype(matmul_dtype)
        w2 = w2.astype(matmul_dtype)
        # Prefer bf16 activations from the producer; cast only if needed.
        if x_noise.dtype != matmul_dtype:
            x_noise = x_noise.astype(matmul_dtype)
        if x_cond.dtype != matmul_dtype:
            x_cond = x_cond.astype(matmul_dtype)

    tile_b = _choose_tile_b(B, tile_b)
    grid = (pl.cdiv(B, tile_b),)   # ragged last block handled by Pallas masking

    cost = pl.CostEstimate(
        flops=2 * B * ((n_noise + n_cond) * hidden + hidden * n_out),
        transcendentals=B * hidden,
        bytes_accessed=(x_noise.nbytes + x_cond.nbytes + w1n.nbytes
                        + w1c.nbytes + b1f.nbytes + w2.nbytes + b2f.nbytes
                        + B * n_out * jnp.dtype(out_dtype).itemsize),
    )

    return pl.pallas_call(
        _generator_kernel,
        out_shape=jax.ShapeDtypeStruct((B, n_out), out_dtype),
        grid=grid,
        in_specs=[
            pl.BlockSpec((tile_b, n_noise), lambda i: (i, 0)),   # x_noise tile
            pl.BlockSpec((tile_b, n_cond), lambda i: (i, 0)),    # x_cond tile
            pl.BlockSpec((n_noise, hidden), lambda i: (0, 0)),   # W1 (noise rows)
            pl.BlockSpec((n_cond, hidden), lambda i: (0, 0)),    # W1 (cond rows)
            pl.BlockSpec((1, hidden), lambda i: (0, 0)),         # b1
            pl.BlockSpec((hidden, n_out), lambda i: (0, 0)),     # W2
            pl.BlockSpec((1, n_out), lambda i: (0, 0)),          # b2
        ],
        out_specs=pl.BlockSpec((tile_b, n_out), lambda i: (i, 0)),
        compiler_params=pltpu.CompilerParams(
            dimension_semantics=("parallel",)),
        cost_estimate=cost,
    )(x_noise, x_cond, w1n, w1c, b1f, w2, b2f)


def init_generator_params(key, n_inputs, n_outputs, hidden_size=64,
                          dtype=jnp.float32):
    """Init matching nn.Linear's U(-1/sqrt(fan_in), +1/sqrt(fan_in)).

    Weights are stored transposed vs. PyTorch ([in, out] instead of [out, in]);
    biases are kept 2-D ([1, out]) for TPU-friendly broadcasting.
    """
    k1, k2, k3, k4 = jax.random.split(key, 4)
    lim1 = 1.0 / (n_inputs ** 0.5)
    lim2 = 1.0 / (hidden_size ** 0.5)
    w1 = jax.random.uniform(k1, (n_inputs, hidden_size), dtype, -lim1, lim1)
    b1 = jax.random.uniform(k2, (1, hidden_size), dtype, -lim1, lim1)
    w2 = jax.random.uniform(k3, (hidden_size, n_outputs), dtype, -lim2, lim2)
    b2 = jax.random.uniform(k4, (1, n_outputs), dtype, -lim2, lim2)
    return (w1, b1, w2, b2)


def _reference(x_noise, x_cond, params):
    x = jnp.concatenate([x_noise, x_cond], axis=1)
    w1, b1, w2, b2 = params
    return jnp.tanh(x @ w1 + b1) @ w2 + b2


if __name__ == "__main__":
    # Small shapes consistent with the module's forward:
    #   x_noise: [B, noise_dim], x_cond: [B, cond_dim],
    #   n_inputs = noise_dim + cond_dim
    batch, noise_dim, cond_dim = 8, 16, 16
    hidden_size, n_outputs = 64, 8
    n_inputs = noise_dim + cond_dim

    key = jax.random.PRNGKey(0)
    k_noise, k_cond, k_params = jax.random.split(key, 3)

    x_noise = jax.random.normal(k_noise, (batch, noise_dim), jnp.float32)
    x_cond = jax.random.normal(k_cond, (batch, cond_dim), jnp.float32)
    params = init_generator_params(k_params, n_inputs, n_outputs, hidden_size)

    fwd = jax.jit(functools.partial(generator_forward),
                  static_argnames=("tile_b", "matmul_dtype", "out_dtype"))

    # 1) f32 path, tiny batch (single-step grid, block == full batch).
    out = fwd(x_noise, x_cond, params)
    jax.block_until_ready(out)
    ref = _reference(x_noise, x_cond, params)
    assert out.shape == (batch, n_outputs)
    assert jnp.allclose(out, ref, atol=1e-5, rtol=1e-5)

    # 2) ragged batch, multi-step grid (exercises partial last block + pipeline).
    big_b = 50
    kn2, kc2 = jax.random.split(jax.random.PRNGKey(1))
    xn2 = jax.random.normal(kn2, (big_b, noise_dim), jnp.float32)
    xc2 = jax.random.normal(kc2, (big_b, cond_dim), jnp.float32)
    ref2 = _reference(xn2, xc2, params)

    out2 = fwd(xn2, xc2, params, tile_b=16)          # grid = cdiv(50,16) = 4
    jax.block_until_ready(out2)
    assert out2.shape == (big_b, n_outputs)
    assert jnp.allclose(out2, ref2, atol=1e-5, rtol=1e-5)

    out2b = fwd(xn2, xc2, params)                    # default tile -> 2 steps
    jax.block_until_ready(out2b)
    assert jnp.allclose(out2b, ref2, atol=1e-5, rtol=1e-5)

    # 3) bf16 matmul-input path, f32 accumulation/epilogue -> loose tolerance.
    #    (Producer-side bf16 is preferred in real use; this exercises the
    #    fallback cast.)
    out3 = fwd(x_noise, x_cond, params, matmul_dtype=jnp.bfloat16)
    jax.block_until_ready(out3)
    assert out3.shape == (batch, n_outputs)
    assert jnp.allclose(out3, ref, atol=1e-1, rtol=1e-1)

    print("KERNEL_OK")
</pallas_src>

<mosaic_0001>
module attributes {stable_mosaic.version = 11 : i64} {
  func.func @_generator_kernel(%arg0: i32, %arg1: memref<8x16xf32, #tpu.memory_space<vmem>>, %arg2: memref<8x16xf32, #tpu.memory_space<vmem>>, %arg3: memref<16x64xf32, #tpu.memory_space<vmem>>, %arg4: memref<16x64xf32, #tpu.memory_space<vmem>>, %arg5: memref<1x64xf32, #tpu.memory_space<vmem>>, %arg6: memref<64x8xf32, #tpu.memory_space<vmem>>, %arg7: memref<1x8xf32, #tpu.memory_space<vmem>>, %arg8: memref<8x8xf32, #tpu.memory_space<vmem>>) attributes {dimension_semantics = [#tpu.dimension_semantics<parallel>], iteration_bounds = array<i64: 1>, scalar_prefetch = 0 : i64, scratch_operands = 0 : i64, tpu.core_type = #tpu.core_type<tc>, window_params = [{transform_indices = @transform_0, window_bounds = array<i64: 8, 16>}, {transform_indices = @transform_1, window_bounds = array<i64: 8, 16>}, {pipeline_mode = #tpu.pipeline_mode<synchronous>, transform_indices = @transform_2, window_bounds = array<i64: 16, 64>}, {pipeline_mode = #tpu.pipeline_mode<synchronous>, transform_indices = @transform_3, window_bounds = array<i64: 16, 64>}, {pipeline_mode = #tpu.pipeline_mode<synchronous>, transform_indices = @transform_4, window_bounds = array<i64: 1, 64>}, {pipeline_mode = #tpu.pipeline_mode<synchronous>, transform_indices = @transform_5, window_bounds = array<i64: 64, 8>}, {pipeline_mode = #tpu.pipeline_mode<synchronous>, transform_indices = @transform_6, window_bounds = array<i64: 1, 8>}, {transform_indices = @transform_7, window_bounds = array<i64: 8, 8>}]} {
    %c0 = arith.constant 0 : index
    %c0_0 = arith.constant 0 : index
    %0 = vector.load %arg1[%c0, %c0_0] : memref<8x16xf32, #tpu.memory_space<vmem>>, vector<8x16xf32>
    %c0_1 = arith.constant 0 : index
    %c0_2 = arith.constant 0 : index
    %1 = vector.load %arg3[%c0_1, %c0_2] : memref<16x64xf32, #tpu.memory_space<vmem>>, vector<16x64xf32>
    %cst = arith.constant dense<0.000000e+00> : vector<8x64xf32>
    %2 = tpu.matmul %0, %1, %cst {dimension_numbers = #tpu.dot_dimension_numbers<[1], [0], [0], [1], [0, 0, 1, 1], [], []>} : vector<8x16xf32>, vector<16x64xf32>, vector<8x64xf32> -> vector<8x64xf32>
    %c0_3 = arith.constant 0 : index
    %c0_4 = arith.constant 0 : index
    %3 = vector.load %arg2[%c0_3, %c0_4] : memref<8x16xf32, #tpu.memory_space<vmem>>, vector<8x16xf32>
    %c0_5 = arith.constant 0 : index
    %c0_6 = arith.constant 0 : index
    %4 = vector.load %arg4[%c0_5, %c0_6] : memref<16x64xf32, #tpu.memory_space<vmem>>, vector<16x64xf32>
    %cst_7 = arith.constant dense<0.000000e+00> : vector<8x64xf32>
    %5 = tpu.matmul %3, %4, %cst_7 {dimension_numbers = #tpu.dot_dimension_numbers<[1], [0], [0], [1], [0, 0, 1, 1], [], []>} : vector<8x16xf32>, vector<16x64xf32>, vector<8x64xf32> -> vector<8x64xf32>
    %6 = arith.addf %2, %5 : vector<8x64xf32>
    %c0_8 = arith.constant 0 : index
    %c0_9 = arith.constant 0 : index
    %7 = vector.load %arg5[%c0_8, %c0_9] : memref<1x64xf32, #tpu.memory_space<vmem>>, vector<1x64xf32>
    %8 = vector.broadcast %7 : vector<1x64xf32> to vector<8x64xf32>
    %9 = arith.addf %6, %8 : vector<8x64xf32>
    %10 = math.tanh %9 : vector<8x64xf32>
    %c0_10 = arith.constant 0 : index
    %c0_11 = arith.constant 0 : index
    %11 = vector.load %arg6[%c0_10, %c0_11] : memref<64x8xf32, #tpu.memory_space<vmem>>, vector<64x8xf32>
    %cst_12 = arith.constant dense<0.000000e+00> : vector<8x8xf32>
    %12 = tpu.matmul %10, %11, %cst_12 {dimension_numbers = #tpu.dot_dimension_numbers<[1], [0], [0], [1], [0, 0, 1, 1], [], []>} : vector<8x64xf32>, vector<64x8xf32>, vector<8x8xf32> -> vector<8x8xf32>
    %c0_13 = arith.constant 0 : index
    %c0_14 = arith.constant 0 : index
    %13 = vector.load %arg7[%c0_13, %c0_14] : memref<1x8xf32, #tpu.memory_space<vmem>>, vector<1x8xf32>
    %14 = vector.broadcast %13 : vector<1x8xf32> to vector<8x8xf32>
    %15 = arith.addf %12, %14 : vector<8x8xf32>
    %c0_15 = arith.constant 0 : index
    %c0_16 = arith.constant 0 : index
    %16 = vector.load %arg8[%c0_15, %c0_16] : memref<8x8xf32, #tpu.memory_space<vmem>>, vector<8x8xf32>
    tpu.vector_store %arg8[%c0_15, %c0_16], %15 {strides = array<i32>} : memref<8x8xf32, #tpu.memory_space<vmem>>, vector<8x8xf32>,
    return
  }
  func.func @transform_0(%arg0: i32) -> (i32, i32) {
    %c0_i32 = arith.constant 0 : i32
    %c0_i32_0 = arith.constant 0 : i32
    return %arg0, %c0_i32 : i32, i32
  }
  func.func @transform_1(%arg0: i32) -> (i32, i32) {
    %c0_i32 = arith.constant 0 : i32
    %c0_i32_0 = arith.constant 0 : i32
    return %arg0, %c0_i32 : i32, i32
  }
  func.func @transform_2(%arg0: i32) -> (i32, i32) {
    %c0_i32 = arith.constant 0 : i32
    %c0_i32_0 = arith.constant 0 : i32
    %c0_i32_1 = arith.constant 0 : i32
    return %c0_i32, %c0_i32_0 : i32, i32
  }
  func.func @transform_3(%arg0: i32) -> (i32, i32) {
    %c0_i32 = arith.constant 0 : i32
    %c0_i32_0 = arith.constant 0 : i32
    %c0_i32_1 = arith.constant 0 : i32
    return %c0_i32, %c0_i32_0 : i32, i32
  }
  func.func @transform_4(%arg0: i32) -> (i32, i32) {
    %c0_i32 = arith.constant 0 : i32
    %c0_i32_0 = arith.constant 0 : i32
    %c0_i32_1 = arith.constant 0 : i32
    return %c0_i32, %c0_i32_0 : i32, i32
  }
  func.func @transform_5(%arg0: i32) -> (i32, i32) {
    %c0_i32 = arith.constant 0 : i32
    %c0_i32_0 = arith.constant 0 : i32
    %c0_i32_1 = arith.constant 0 : i32
    return %c0_i32, %c0_i32_0 : i32, i32
  }
  func.func @transform_6(%arg0: i32) -> (i32, i32) {
    %c0_i32 = arith.constant 0 : i32
    %c0_i32_0 = arith.constant 0 : i32
    %c0_i32_1 = arith.constant 0 : i32
    return %c0_i32, %c0_i32_0 : i32, i32
  }
  func.func @transform_7(%arg0: i32) -> (i32, i32) {
    %c0_i32 = arith.constant 0 : i32
    %c0_i32_0 = arith.constant 0 : i32
    return %arg0, %c0_i32 : i32, i32
  }
}

</mosaic_0001>

<bundles_post_ra>
// kernel: generator_forward.1
= control target key start
LH: loop header
LB: loop body
LE: loop exit
PB: predicated region body
PF: predicated region fallthrough
CT: control target
= control target key end

     0   :  { %v374_v1 = vmov 0.0   ;;  %vm375_vm0 = vmmov 0   ;;  %vm33_vm1 = vcmask 130048   ;;  %s468_s0 = inlined_call_operand.vmem [shape: f32[8,16], index: 0, kind: input, shape index: {}]   ;;  %s469_s1 = inlined_call_operand.vmem [shape: f32[8,16], index: 1, kind: input, shape index: {}]   ;;  %s470_s2 = inlined_call_operand.vmem [shape: f32[16,64], index: 2, kind: input, shape index: {}]   ;;  %s471_s3 = inlined_call_operand.vmem [shape: f32[16,64], index: 3, kind: input, shape index: {}]   ;;  %s472_s4 = inlined_call_operand.vmem [shape: f32[1,64], index: 4, kind: input, shape index: {}]   ;;  %s473_s5 = inlined_call_operand.vmem [shape: f32[64,8], index: 5, kind: input, shape index: {}]   ;;  %s474_s6 = inlined_call_operand.vmem [shape: f32[1,8], index: 6, kind: input, shape index: {}]   ;;  %s475_s7 = inlined_call_operand.hbm [shape: f32[8,8], index: 7, kind: output, shape index: {}]  }
   0x1   :  { %v32_v0 = vld [vmem:[%s471_s3 + $0x8] sm:$0xff]  ;;  %314 = vmatprep.subr.mxu1 %v374_v1  ;;  %v31_v2 = vld [vmem:[%s471_s3] sm:$0xff]  ;;  %318 = vmatprep.mubr.msk.f32.mxu1 %vm375_vm0, %v374_v1 }
   0x2   :  { %315 = vmatpush3.msra.mxu1 %v32_v0  ;;  %v30_v3 = vld [vmem:[%s469_s1] sm:$0xff]  ;;  %328 = vmatprep.subr.mxu0 %v374_v1 }
   0x3   :  { %12 = vsyncpa [#allocation3], 0  ;;  %316 = vmatprep.subr.mxu1 %v374_v1  ;;  %v29_v4 = vld [vmem:[%s470_s2 + $0x8] sm:$0xff]  ;;  %344 = vmatprep.mubr.msk.f32.mxu0 %vm375_vm0, %v374_v1  ;;  %v28_v5 = vld [vmem:[%s470_s2] sm:$0xff]  ;;  %vm204_vm2 = vcmask 523264   ;;  %vm278_vm3 = vcmask 64512  }
   0x4   :  { %317 = vmatpush3.msra.mxu1 %v31_v2  ;;  %v27_v6 = vld [vmem:[%s468_s0] sm:$0xff]  ;;  %v196_v7 = vld [vmem:[%s473_s5 + $0x38] sm:$0xff]  ;;  %v195_v8 = vld [vmem:[%s473_s5 + $0x30] sm:$0xff] }
   0x5   :  { %319 = vmatmul.mubr.msk.f32.vlgmr.msra.gmra.mxu1 %vm33_vm1, %v30_v3  ;;  %321 = vmatprep.subr.mxu1 %v374_v1  ;;  %v194_v9 = vld [vmem:[%s473_s5 + $0x28] sm:$0xff]  ;;  %v193_v10 = vld [vmem:[%s473_s5 + $0x20] sm:$0xff]  ;;  %v192_v11 = vld [vmem:[%s473_s5 + $0x18] sm:$0xff] }
   0x6   :  { %322 = vmatpush3.msra.mxu1 %v29_v4  ;;  %325 = vmatprep.mubr.msk.f32.mxu1 %vm375_vm0, %v374_v1  ;;  %v191_v12 = vld [vmem:[%s473_s5 + $0x10] sm:$0xff]  ;;  %v190_v13 = vld [vmem:[%s473_s5 + $0x8] sm:$0xff]  ;;  %v189_v14 = vld [vmem:[%s473_s5] sm:$0xff]  ;;  %s376_s5 = smov [#allocation2]  }
   0x7   :  { %323 = vmatprep.subr.mxu1 %v374_v1  ;;  %329 = vmatpush3.msra.mxu0 %v196_v7  ;;  %v296_v18 = vld [vmem:[%s472_s4] ss:$0 sm:$0xff]  ;;  %s286_s29 = sshll.u32 %s376_s5, 4  ;;  %s287_s29 = int_to_ptr.vmem [resolvable:$true] %s286_s29 }
   0x8   :  { %324 = vmatpush3.msra.mxu1 %v28_v5  ;;  %330 = vmatprep.subr.mxu0 %v374_v1  ;;  %v297_v23 = vld [vmem:[%s474_s6] ss:$0 sm:$0xff]  ;;  %s352_s4 = scalar_lea.vmem %s287_s29, 128  ;;  %p357_p1 = scmp.lt.s32.totalorder %s287_s29, %s287_s29 }
   0x9   :  { %326 = vmatmul.mubr.msk.f32.vlgmr.msra.gmra.mxu1 %vm33_vm1, %v27_v6  ;;  %331 = vmatpush3.msra.mxu0 %v195_v8  ;;  %p353_p0 = scmp.ne.s32.totalorder %s287_s29, %s352_s4  ;;  %p358_p2 = scmp.lt.s32.totalorder %s352_s4, %s352_s4 }
   0xa   :  { %332 = vmatprep.subr.mxu0 %v374_v1 }
   0xb   :  { %333 = vmatpush3.msra.mxu0 %v194_v9  ;;  %p359_p3 = por %p358_p2, %p357_p1 }
   0xc   :  { %334 = vmatprep.subr.mxu0 %v374_v1 }
   0xd   :  { %335 = vmatpush3.msra.mxu0 %v193_v10  ;;  %p360_p4 = pnand %p359_p3, %p353_p0 }
   0xe   :  { %336 = vmatprep.subr.mxu0 %v374_v1 }
   0xf   :  { %337 = vmatpush3.msra.mxu0 %v192_v11 }
  0x10   :  { %338 = vmatprep.subr.mxu0 %v374_v1 }
  0x11   :  { %339 = vmatpush3.msra.mxu0 %v191_v12 }
  0x12   :  { %340 = vmatprep.subr.mxu0 %v374_v1 }
  0x13   :  { %341 = vmatpush3.msra.mxu0 %v190_v13 }
  0x14   :  { %342 = vmatprep.subr.mxu0 %v374_v1 }
  0x15   :  { %343 = vmatpush3.msra.mxu0 %v189_v14 }
  0xc5   :  { %v103_v15 = vpop.f32.mrf.mxu1 }
  0xc7   :  { %v320_v16 = vpop.f32.mrf.mxu1 }
  0xc9   :  { %v176_v17 = vpop.f32.mrf.mxu1 }
  0xca   :  { %v177_v19 = vadd.f32 %v176_v17, %v103_v15 }
  0xcb   :  { %v327_v20 = vpop.f32.mrf.mxu1 }
  0xcc   :  { %v187_v21 = vadd.f32 %v296_v18, %v177_v19 }
  0xce   :  { %350 = vtanh.f32 %v187_v21 }
  0xdb   :  { %v351_v22 = vpop.eup %350 }
  0xdc   :  { %345 = vmatmul.mubr.msk.f32.vlgmr.msra.gmra.mxu0 %vm204_vm2, %v351_v22 }
 0x19c   :  { %v274_v24 = vpop.f32.mrf.mxu0 }
 0x19d   :  { %v275_v25 = vadd.f32 %v297_v23, %v274_v24 }
 0x19e   :  { %v346_v26 = vpop.f32.mrf.mxu0 }
 0x19f   :  { %279 = vst.msk [vmem:[#allocation2] sm:$0xff] %vm278_vm3, %v275_v25 }
 0x1a0   :  { %363 = shalt.err (!%p360_p4)
}
 0x1a1   :  { %289 = dma.vmem_to_hbm [thread:$0]  %s287_s29, 128, %s475_s7, [#allocation3]  }
 0x1a2   :  { %372 = dma.done.wait [#allocation3], 128  }
 0x1a3   :  { %373 = vsyncadd [#allocation3], 4294967168 }
 0x1a4   :  { %293 = vsyncpa [#allocation3], 1 }

</bundles_post_ra>
